<compile_context>
chip_gen: v7x
topology: tpu7x:2x2x1
jax: 0.10.0
libtpu: 0.0.40
codegen_flags: <defaults>
</compile_context>

<pallas_src>
import functools

import jax
import jax.numpy as jnp
from jax.experimental import pallas as pl
from jax.experimental.pallas import tpu as pltpu


def _mlp_kernel(x_ref, w1_ref, w2_ref, vec_ref, o_ref, *, eps: float, mxu_dtype):
    # x_ref: (D, t) tile -- channels on sublanes, tokens on the 128-lane axis.
    x = x_ref[...]
    x32 = x.astype(jnp.float32)
    xm = x.astype(mxu_dtype)

    vecs = vec_ref[...]                 # (D, 4) f32 = [b1 | b2 | gamma | beta]
    b1 = vecs[:, 0:1]
    b2 = vecs[:, 1:2]
    gamma = vecs[:, 2:3]
    beta = vecs[:, 3:4]

    # fc1 (1x1 conv == W1 @ x + b1) + ReLU   (MXU + VPU)
    h = jnp.dot(w1_ref[...], xm, preferred_element_type=jnp.float32)
    h = jnp.maximum(h + b1, 0.0)

    # Dropout(p=0.15) -> identity in eval mode.
    # fc2 (1x1 conv)
    h = jnp.dot(w2_ref[...], h.astype(mxu_dtype),
                preferred_element_type=jnp.float32) + b2

    # residual + LayerNorm over the channel dim (axis 0 here), all in f32.
    r = h + x32
    mean = jnp.mean(r, axis=0, keepdims=True)
    centered = r - mean
    var = jnp.mean(centered * centered, axis=0, keepdims=True)
    y = centered * jax.lax.rsqrt(var + eps)
    y = y * gamma + beta
    o_ref[...] = y.astype(o_ref.dtype)


def mlp_forward(x_nchw, w1, b1, w2, b2, gamma, beta, *, eps=1e-5, t_tok=2048,
                mxu_dtype=jnp.bfloat16, io_dtype=None):
    """x_nchw: [B, D, P, N]; w1/w2: [D, D, 1, 1]; b1/b2/gamma/beta: [D].

    io_dtype: dtype used for activations at the HBM boundary (input is cast,
    output is emitted in this dtype).  None -> keep the input dtype.
    In-kernel residual / LayerNorm math is always f32.
    """
    B, D, P, N = x_nchw.shape
    T = P * N
    out_dtype = jnp.dtype(x_nchw.dtype) if io_dtype is None else jnp.dtype(io_dtype)

    # Lane-sparse small-T case: fold the batch axis into the token/lane axis
    # (one transpose each way) so the output tile is lane-denser.
    fold_batch = (T < 128) and (B > 1)
    if fold_batch:
        x_3d = jnp.transpose(x_nchw, (1, 0, 2, 3)).reshape(1, D, B * T)
        B_eff, T_tot = 1, B * T
    else:
        x_3d = x_nchw.reshape(B, D, T)
        B_eff, T_tot = B, T
    x_3d = x_3d.astype(out_dtype)

    # ---- capacity-derived token tile (lane axis) --------------------------
    x_item = jnp.dtype(out_dtype).itemsize
    w_item = jnp.dtype(mxu_dtype).itemsize
    try:
        vmem_cap = int(pltpu.get_tpu_info().vmem_capacity_bytes)
    except Exception:
        vmem_cap = 64 << 20                       # v7x per-core floor
    budget = int(0.8 * vmem_cap)

    fixed = (2 * 2 * D * D * w_item               # W1 + W2 (worst case 2 bufs)
             + 2 * D * 128 * 4)                   # packed vec block, lane-padded
    per_lane = (2 * 2 * D * x_item                # x + out blocks, double-buffered
                + 8 * D * 4)                      # in-kernel f32 temporaries
    t_cap = max(128, (budget - fixed) // per_lane)

    if T_tot <= 128:
        t_eff = T_tot
        n_t = 1
    else:
        t_eff = min(t_tok, t_cap, T_tot)
        # Multiple of 256 when possible (fills the 256-wide MXU N dim), else 128.
        t_eff = (t_eff // 256) * 256 if t_eff >= 256 else 128
        n_t = pl.cdiv(T_tot, t_eff)
        # Keep both v7x TensorCores busy when the grid would otherwise be (1,1).
        if B_eff == 1 and n_t == 1 and T_tot >= 256:
            t_eff = ((pl.cdiv(T_tot, 2) + 127) // 128) * 128
            n_t = pl.cdiv(T_tot, t_eff)

    # ---- parameter packing (free reshapes / tiny stacks only) -------------
    w1_2d = w1.reshape(D, D).astype(mxu_dtype)
    w2_2d = w2.reshape(D, D).astype(mxu_dtype)
    vecs = jnp.stack([b1, b2, gamma, beta], axis=1).astype(jnp.float32)   # (D, 4)

    est = fixed + per_lane * t_eff
    vmem_limit = int(min(max(int(1.25 * est), 32 << 20), int(0.95 * vmem_cap)))

    cost = pl.CostEstimate(
        flops=4 * D * D * T_tot * B_eff,                       # two DxD matmuls / token
        transcendentals=T_tot * B_eff,                         # one rsqrt per token
        bytes_accessed=(2 * B_eff * D * T_tot * x_item
                        + 2 * D * D * w_item + D * 4 * 4))

    def io_spec():
        return pl.BlockSpec((None, D, t_eff), lambda b, t: (b, 0, t))

    out_3d = pl.pallas_call(
        functools.partial(_mlp_kernel, eps=eps, mxu_dtype=mxu_dtype),
        out_shape=jax.ShapeDtypeStruct((B_eff, D, T_tot), out_dtype),
        grid_spec=pltpu.PrefetchScalarGridSpec(
            num_scalar_prefetch=0,
            grid=(B_eff, n_t),
            in_specs=[
                io_spec(),                                     # x tile (D, t)
                pl.BlockSpec((D, D), lambda b, t: (0, 0)),     # W1
                pl.BlockSpec((D, D), lambda b, t: (0, 0)),     # W2
                pl.BlockSpec((D, 4), lambda b, t: (0, 0)),     # [b1|b2|gamma|beta]
            ],
            out_specs=io_spec(),
        ),
        compiler_params=pltpu.CompilerParams(
            dimension_semantics=("parallel", "parallel"),
            vmem_limit_bytes=vmem_limit),
        cost_estimate=cost,
    )(x_3d, w1_2d, w2_2d, vecs)

    if fold_batch:
        return jnp.transpose(out_3d.reshape(D, B, P, N), (1, 0, 2, 3))
    return out_3d.reshape(B, D, P, N)


def _reference(x, w1, b1, w2, b2, gamma, beta, eps=1e-5):
    # Pure-JAX reference mirroring the PyTorch forward (eval mode).
    x_t = jnp.transpose(x, (0, 2, 3, 1))                        # [B,P,N,D]
    h = jnp.einsum("bpnd,od->bpno", x_t, w1[:, :, 0, 0]) + b1
    h = jnp.maximum(h, 0.0)
    h = jnp.einsum("bpnd,od->bpno", h, w2[:, :, 0, 0]) + b2
    r = h + x_t
    mean = jnp.mean(r, axis=-1, keepdims=True)
    var = jnp.mean((r - mean) ** 2, axis=-1, keepdims=True)
    y = (r - mean) / jnp.sqrt(var + eps) * gamma + beta
    return jnp.transpose(y, (0, 3, 1, 2))


def _make_inputs(key, B, D, P, N):
    kx, k1, k2, k3, k4 = jax.random.split(key, 5)
    x = jax.random.normal(kx, (B, D, P, N), dtype=jnp.float32)
    w1 = jax.random.normal(k1, (D, D, 1, 1), dtype=jnp.float32) * 0.1
    b1 = jax.random.normal(k2, (D,), dtype=jnp.float32) * 0.1
    w2 = jax.random.normal(k3, (D, D, 1, 1), dtype=jnp.float32) * 0.1
    b2 = jax.random.normal(k4, (D,), dtype=jnp.float32) * 0.1
    gamma = jnp.ones((D,), dtype=jnp.float32)
    beta = jnp.zeros((D,), dtype=jnp.float32)
    return x, w1, b1, w2, b2, gamma, beta


if __name__ == "__main__":
    key = jax.random.PRNGKey(0)
    k_small, k_ragged = jax.random.split(key, 2)

    # ---- small demo (lane-sparse path: batch folded into the lane axis) ----
    B, D, P, N = 2, 32, 4, 8
    x, w1, b1, w2, b2, gamma, beta = _make_inputs(k_small, B, D, P, N)

    out_f32 = mlp_forward(x, w1, b1, w2, b2, gamma, beta, mxu_dtype=jnp.float32)
    out_bf16 = mlp_forward(x, w1, b1, w2, b2, gamma, beta)                 # bf16 MXU
    out_bf16_io = mlp_forward(x, w1, b1, w2, b2, gamma, beta,
                              io_dtype=jnp.bfloat16)                       # bf16 HBM I/O
    jax.block_until_ready((out_f32, out_bf16, out_bf16_io))

    ref = _reference(x, w1, b1, w2, b2, gamma, beta)
    assert out_f32.shape == (B, D, P, N), out_f32.shape
    assert jnp.allclose(out_f32, ref, atol=1e-3, rtol=1e-3), float(
        jnp.max(jnp.abs(out_f32 - ref)))
    assert jnp.allclose(out_bf16, ref, atol=5e-2, rtol=5e-2), float(
        jnp.max(jnp.abs(out_bf16 - ref)))
    assert jnp.allclose(out_bf16_io.astype(jnp.float32), ref,
                        atol=8e-2, rtol=8e-2), float(
        jnp.max(jnp.abs(out_bf16_io.astype(jnp.float32) - ref)))

    # ---- ragged-token case (T=150: partial grid-edge block) + B==1 path ----
    B2, D2, P2, N2 = 1, 64, 5, 30
    x2, w1b, b1b, w2b, b2b, g2, be2 = _make_inputs(k_ragged, B2, D2, P2, N2)
    out2 = mlp_forward(x2, w1b, b1b, w2b, b2b, g2, be2, mxu_dtype=jnp.float32)
    jax.block_until_ready(out2)
    ref2 = _reference(x2, w1b, b1b, w2b, b2b, g2, be2)
    assert out2.shape == (B2, D2, P2, N2), out2.shape
    assert jnp.allclose(out2, ref2, atol=1e-3, rtol=1e-3), float(
        jnp.max(jnp.abs(out2 - ref2)))

    print("KERNEL_OK")
</pallas_src>

<mosaic_0001>
module attributes {stable_mosaic.version = 11 : i64} {
  func.func @_mlp_kernel(%arg0: i32, %arg1: i32, %arg2: memref<1x32x64xf32, #tpu.memory_space<vmem>>, %arg3: memref<32x32xf32, #tpu.memory_space<vmem>>, %arg4: memref<32x32xf32, #tpu.memory_space<vmem>>, %arg5: memref<32x4xf32, #tpu.memory_space<vmem>>, %arg6: memref<1x32x64xf32, #tpu.memory_space<vmem>>) attributes {dimension_semantics = [#tpu.dimension_semantics<parallel>, #tpu.dimension_semantics<parallel>], iteration_bounds = array<i64: 1, 1>, scalar_prefetch = 0 : i64, scratch_operands = 0 : i64, tpu.core_type = #tpu.core_type<tc>, window_params = [{transform_indices = @transform_0, window_bounds = array<i64: 1, 32, 64>}, {pipeline_mode = #tpu.pipeline_mode<synchronous>, transform_indices = @transform_1, window_bounds = array<i64: 32, 32>}, {pipeline_mode = #tpu.pipeline_mode<synchronous>, transform_indices = @transform_2, window_bounds = array<i64: 32, 32>}, {pipeline_mode = #tpu.pipeline_mode<synchronous>, transform_indices = @transform_3, window_bounds = array<i64: 32, 4>}, {transform_indices = @transform_4, window_bounds = array<i64: 1, 32, 64>}]} {
    %c0 = arith.constant 0 : index
    %c0_0 = arith.constant 0 : index
    %c0_1 = arith.constant 0 : index
    %0 = vector.load %arg2[%c0, %c0_0, %c0_1] : memref<1x32x64xf32, #tpu.memory_space<vmem>>, vector<1x32x64xf32>
    %1 = vector.shape_cast %0 : vector<1x32x64xf32> to vector<32x64xf32>
    %c0_2 = arith.constant 0 : index
    %c0_3 = arith.constant 0 : index
    %2 = vector.load %arg5[%c0_2, %c0_3] : memref<32x4xf32, #tpu.memory_space<vmem>>, vector<32x4xf32>
    %3 = vector.extract_strided_slice %2 {offsets = [0, 0], sizes = [32, 1], strides = [1, 1]} : vector<32x4xf32> to vector<32x1xf32>
    %4 = vector.extract_strided_slice %2 {offsets = [0, 1], sizes = [32, 1], strides = [1, 1]} : vector<32x4xf32> to vector<32x1xf32>
    %5 = vector.extract_strided_slice %2 {offsets = [0, 2], sizes = [32, 1], strides = [1, 1]} : vector<32x4xf32> to vector<32x1xf32>
    %6 = vector.extract_strided_slice %2 {offsets = [0, 3], sizes = [32, 1], strides = [1, 1]} : vector<32x4xf32> to vector<32x1xf32>
    %c0_4 = arith.constant 0 : index
    %c0_5 = arith.constant 0 : index
    %7 = vector.load %arg3[%c0_4, %c0_5] : memref<32x32xf32, #tpu.memory_space<vmem>>, vector<32x32xf32>
    %cst = arith.constant dense<0.000000e+00> : vector<32x64xf32>
    %8 = tpu.matmul %7, %1, %cst {dimension_numbers = #tpu.dot_dimension_numbers<[1], [0], [0], [1], [0, 0, 1, 1], [], []>} : vector<32x32xf32>, vector<32x64xf32>, vector<32x64xf32> -> vector<32x64xf32>
    %9 = vector.broadcast %3 : vector<32x1xf32> to vector<32x64xf32>
    %10 = arith.addf %8, %9 : vector<32x64xf32>
    %cst_6 = arith.constant 0.000000e+00 : f32
    %11 = vector.broadcast %cst_6 : f32 to vector<32x64xf32>
    %12 = arith.maximumf %10, %11 : vector<32x64xf32>
    %c0_7 = arith.constant 0 : index
    %c0_8 = arith.constant 0 : index
    %13 = vector.load %arg4[%c0_7, %c0_8] : memref<32x32xf32, #tpu.memory_space<vmem>>, vector<32x32xf32>
    %cst_9 = arith.constant dense<0.000000e+00> : vector<32x64xf32>
    %14 = tpu.matmul %13, %12, %cst_9 {dimension_numbers = #tpu.dot_dimension_numbers<[1], [0], [0], [1], [0, 0, 1, 1], [], []>} : vector<32x32xf32>, vector<32x64xf32>, vector<32x64xf32> -> vector<32x64xf32>
    %15 = vector.broadcast %4 : vector<32x1xf32> to vector<32x64xf32>
    %16 = arith.addf %14, %15 : vector<32x64xf32>
    %17 = arith.addf %16, %1 : vector<32x64xf32>
    %cst_10 = arith.constant dense<0.000000e+00> : vector<64xf32>
    %18 = vector.multi_reduction <add>, %17, %cst_10 [0] : vector<32x64xf32> to vector<64xf32>
    %19 = vector.shape_cast %18 : vector<64xf32> to vector<1x64xf32>
    %cst_11 = arith.constant 3.200000e+01 : f32
    %20 = vector.broadcast %cst_11 : f32 to vector<1x64xf32>
    %21 = arith.divf %19, %20 : vector<1x64xf32>
    %22 = vector.broadcast %21 : vector<1x64xf32> to vector<32x64xf32>
    %23 = arith.subf %17, %22 : vector<32x64xf32>
    %24 = arith.mulf %23, %23 : vector<32x64xf32>
    %cst_12 = arith.constant dense<0.000000e+00> : vector<64xf32>
    %25 = vector.multi_reduction <add>, %24, %cst_12 [0] : vector<32x64xf32> to vector<64xf32>
    %26 = vector.shape_cast %25 : vector<64xf32> to vector<1x64xf32>
    %cst_13 = arith.constant 3.200000e+01 : f32
    %27 = vector.broadcast %cst_13 : f32 to vector<1x64xf32>
    %28 = arith.divf %26, %27 : vector<1x64xf32>
    %cst_14 = arith.constant 9.99999974E-6 : f32
    %29 = vector.broadcast %cst_14 : f32 to vector<1x64xf32>
    %30 = arith.addf %28, %29 : vector<1x64xf32>
    %31 = math.rsqrt %30 : vector<1x64xf32>
    %32 = vector.broadcast %31 : vector<1x64xf32> to vector<32x64xf32>
    %33 = arith.mulf %23, %32 : vector<32x64xf32>
    %34 = vector.broadcast %5 : vector<32x1xf32> to vector<32x64xf32>
    %35 = arith.mulf %33, %34 : vector<32x64xf32>
    %36 = vector.broadcast %6 : vector<32x1xf32> to vector<32x64xf32>
    %37 = arith.addf %35, %36 : vector<32x64xf32>
    %c0_15 = arith.constant 0 : index
    %c0_16 = arith.constant 0 : index
    %c0_17 = arith.constant 0 : index
    %38 = vector.load %arg6[%c0_15, %c0_16, %c0_17] : memref<1x32x64xf32, #tpu.memory_space<vmem>>, vector<1x32x64xf32>
    %39 = vector.shape_cast %38 : vector<1x32x64xf32> to vector<32x64xf32>
    %40 = vector.shape_cast %37 : vector<32x64xf32> to vector<1x32x64xf32>
    tpu.vector_store %arg6[%c0_15, %c0_16, %c0_17], %40 {strides = array<i32>} : memref<1x32x64xf32, #tpu.memory_space<vmem>>, vector<1x32x64xf32>,
    return
  }
  func.func @transform_0(%arg0: i32, %arg1: i32) -> (i32, i32, i32) {
    %c0_i32 = arith.constant 0 : i32
    %c0_i32_0 = arith.constant 0 : i32
    return %arg0, %c0_i32, %arg1 : i32, i32, i32
  }
  func.func @transform_1(%arg0: i32, %arg1: i32) -> (i32, i32) {
    %c0_i32 = arith.constant 0 : i32
    %c0_i32_0 = arith.constant 0 : i32
    %c0_i32_1 = arith.constant 0 : i32
    return %c0_i32, %c0_i32_0 : i32, i32
  }
  func.func @transform_2(%arg0: i32, %arg1: i32) -> (i32, i32) {
    %c0_i32 = arith.constant 0 : i32
    %c0_i32_0 = arith.constant 0 : i32
    %c0_i32_1 = arith.constant 0 : i32
    return %c0_i32, %c0_i32_0 : i32, i32
  }
  func.func @transform_3(%arg0: i32, %arg1: i32) -> (i32, i32) {
    %c0_i32 = arith.constant 0 : i32
    %c0_i32_0 = arith.constant 0 : i32
    %c0_i32_1 = arith.constant 0 : i32
    return %c0_i32, %c0_i32_0 : i32, i32
  }
  func.func @transform_4(%arg0: i32, %arg1: i32) -> (i32, i32, i32) {
    %c0_i32 = arith.constant 0 : i32
    %c0_i32_0 = arith.constant 0 : i32
    return %arg0, %c0_i32, %arg1 : i32, i32, i32
  }
}

</mosaic_0001>

<bundles_post_ra>
// kernel: tpu_custom_call.1
= control target key start
LH: loop header
LB: loop body
LE: loop exit
PB: predicated region body
PF: predicated region fallthrough
CT: control target
= control target key end

     0   :  { %9 = vsyncpa [#allocation3], 0  ;;  %s705_s0 = inlined_call_operand.vmem [shape: f32[1,32,64], index: 0, kind: input, shape index: {}]   ;;  %s706_s1 = inlined_call_operand.hbm [shape: f32[32,32], index: 1, kind: input, shape index: {}]   ;;  %s707_s2 = inlined_call_operand.hbm [shape: f32[32,32], index: 2, kind: input, shape index: {}]   ;;  %s708_s3 = inlined_call_operand.vmem [shape: f32[32,4], index: 3, kind: input, shape index: {}]   ;;  %s709_s4 = inlined_call_operand.hbm [shape: f32[1,32,64], index: 4, kind: output, shape index: {}]  }
   0x1   :  { %10 = vsyncpa [#allocation6], 0 }
   0x2   :  { %11 = vsyncpa [#allocation4], 0  ;;  %s566_s15 = smov [#allocation2]   ;;  %s494_s19 = scalar_lea.hbm %s706_s1, 512 }
   0x3   :  { %s19_s16 = sshll.u32 %s566_s15, 4  ;;  %p495_p0 = scmp.ne.s32.totalorder %s706_s1, %s494_s19  ;;  %s20_s16 = int_to_ptr.vmem [resolvable:$true] %s19_s16 }
   0x4   :  { %p498_p1 = scmp.lt.u32.totalorder %s494_s19, %s706_s1 }
   0x6   :  { %p500_p2 = pnand %p498_p1, %p495_p0 }
   0x8   :  { %503 = shalt.err (!%p500_p2)
}
   0x9   :  { %s504_s24 = scalar_lea.vmem %s20_s16, 512  ;;  %p509_p4 = scmp.lt.s32.totalorder %s20_s16, %s20_s16 }
   0xa   :  { %p505_p3 = scmp.ne.s32.totalorder %s20_s16, %s504_s24  ;;  %p510_p5 = scmp.lt.s32.totalorder %s504_s24, %s504_s24 }
   0xc   :  { %p511_p6 = por %p510_p5, %p509_p4 }
   0xe   :  { %p512_p7 = pnand %p511_p6, %p505_p3 }
  0x10   :  { %515 = shalt.err (!%p512_p7)
}
  0x11   :  { %s567_s25 = smov 128   ;;  %s568_s26 = smov 8  }
  0x12   :  { %25 = dma.hbm_to_vmem [thread:$0]  %s706_s1, 512, %s20_s16, [#allocation3], %s567_s25, %s567_s25, %s568_s26  }
  0x13   :  { %s569_s29 = smov [#allocation5]   ;;  %s516_s7 = scalar_lea.hbm %s707_s2, 512 }
  0x14   :  { %s31_s30 = sshll.u32 %s569_s29, 4  ;;  %p517_p8 = scmp.ne.s32.totalorder %s707_s2, %s516_s7  ;;  %s32_s30 = int_to_ptr.vmem [resolvable:$true] %s31_s30 }
  0x15   :  { %p520_p9 = scmp.lt.u32.totalorder %s516_s7, %s707_s2 }
  0x17   :  { %p522_p10 = pnand %p520_p9, %p517_p8 }
  0x19   :  { %525 = shalt.err (!%p522_p10)
}
  0x1a   :  { %s526_s12 = scalar_lea.vmem %s32_s30, 512  ;;  %p531_p12 = scmp.lt.s32.totalorder %s32_s30, %s32_s30 }
  0x1b   :  { %p527_p11 = scmp.ne.s32.totalorder %s32_s30, %s526_s12  ;;  %p532_p13 = scmp.lt.s32.totalorder %s526_s12, %s526_s12 }
  0x1d   :  { %p533_p0 = por %p532_p13, %p531_p12 }
  0x1f   :  { %p534_p1 = pnand %p533_p0, %p527_p11 }
  0x21   :  { %537 = shalt.err (!%p534_p1)
}
  0x22   :  { %37 = dma.hbm_to_vmem [thread:$0]  %s707_s2, 512, %s32_s30, [#allocation6], %s567_s25, %s567_s25, %s568_s26  }
  0x23   :  { %560 = dma.done.wait [#allocation3], 512  }
  0x24   :  { %561 = vsyncadd [#allocation3], 4294966784 }
  0x25   :  { %562 = dma.done.wait [#allocation6], 512  }
  0x26   :  { %563 = vsyncadd [#allocation6], 4294966784  ;;  %v570_v0 = vmov 0   ;;  %vm78_vm0 = vcmask 261120   ;;  %v633_v1 = vld [vmem:[%s705_s0] sm:$0xff]  ;;  %v638_v2 = vld [vmem:[%s705_s0 + $0x8] sm:$0xff] }
  0x27   :  { %484 = vset.pattern.permute.xlu0 %v570_v0  ;;  %485 = vset.pattern.permute.xlu1 %v570_v0  ;;  %v643_v3 = vld [vmem:[%s705_s0 + $0x10] sm:$0xff]  ;;  %v459_v4 = vpack.c.bf16 %v638_v2, %v633_v1  ;;  %v650_v5 = vld [vmem:[%s705_s0 + $0x18] sm:$0xff]  ;;  %v54_v6 = vld [vmem:[#allocation2] sm:$0xff]  ;;  %v571_v16 = vmov 1   ;;  %v572_v17 = vmov 2   ;;  %v573_v18 = vmov 3  }
  0x28   :  { %v463_v7 = vpack.c.bf16 %v650_v5, %v643_v3  ;;  %439 = vmatprep.mubr.msk.f32.mxu0 %vm78_vm0, %v54_v6  ;;  %v50_v8 = vld [vmem:[%s708_s3] sm:$0xff]  ;;  %v52_v9 = vld [vmem:[%s708_s3 + $0x10] sm:$0xff]  ;;  %v51_v10 = vld [vmem:[%s708_s3 + $0x8] sm:$0xff]  ;;  %vm301_vm1 = vcmask 523264  }
  0x29   :  { %460 = vmatprep.subr.bf16.mxu0 %v459_v4  ;;  %60 = vperm.xlu0 %484, %v50_v8   ;;  %v53_v11 = vld [vmem:[%s708_s3 + $0x18] sm:$0xff]  ;;  %v55_v12 = vld [vmem:[#allocation2 + $0x8] sm:$0xff]  ;;  %v56_v13 = vld [vmem:[#allocation2 + $0x10] sm:$0xff]  ;;  %s574_s3 = smov [#allocation7]  }
  0x2a   :  { %462 = vmatpush3.bf16.msra.mxu0 %v459_v4  ;;  %70 = vperm.xlu1 %485, %v52_v9   ;;  %v57_v14 = vld [vmem:[#allocation2 + $0x18] sm:$0xff]  ;;  %v180_v15 = vld [vmem:[#allocation5] sm:$0xff]  ;;  %v181_v37 = vld [vmem:[#allocation5 + $0x8] sm:$0xff]  ;;  %s394_s30 = sshll.u32 %s574_s3, 4  ;;  %s395_s30 = int_to_ptr.vmem [resolvable:$true] %s394_s30 }
  0x2b   :  { %464 = vmatprep.subr.bf16.mxu0 %v463_v7  ;;  %453 = vmatprep.mubr.msk.f32.mxu1 %vm78_vm0, %v180_v15  ;;  %v182_v38 = vld [vmem:[#allocation5 + $0x10] sm:$0xff]  ;;  %v183_v39 = vld [vmem:[#allocation5 + $0x18] sm:$0xff]  ;;  %s538_s5 = scalar_lea.vmem %s395_s30, 512  ;;  %p543_p3 = scmp.lt.s32.totalorder %s395_s30, %s395_s30 }
  0x2c   :  { %p539_p2 = scmp.ne.s32.totalorder %s395_s30, %s538_s5  ;;  %p544_p4 = scmp.lt.s32.totalorder %s538_s5, %s538_s5 }
  0x2d   :  { %65 = vperm.xlu0 %484, %v51_v10  }
  0x2e   :  { %466 = vmatpush3.bf16.msra.mxu0 %v463_v7  ;;  %75 = vperm.xlu1 %485, %v53_v11   ;;  %p545_p5 = por %p544_p4, %p543_p3 }
  0x30   :  { %p546_p6 = pnand %p545_p5, %p539_p2 }
  0x31   :  { %440 = vmatmul.mubr.msk.f32.vlgmr.msra.gmra.mrb[0].mxu0 %vm78_vm0, %v55_v12  ;;  %486 = vset.pattern.permute.xlu0 %v571_v16 }
  0x32   :  { %442 = vmatprep.mubr.msk.f32.mxu0 %vm78_vm0, %v56_v13  ;;  %487 = vset.pattern.permute.xlu1 %v571_v16 }
  0x33   :  { %189 = vperm.xlu1 %487, %v51_v10   ;;  %185 = vperm.xlu0 %486, %v50_v8  }
  0x35   :  { %443 = vmatmul.mubr.msk.f32.gmra.mrb[2].mxu0 %vm78_vm0, %v57_v14 }
  0x37   :  { %193 = vperm.xlu1 %487, %v52_v9   ;;  %197 = vperm.xlu0 %486, %v53_v11  }
  0x3b   :  { %488 = vset.pattern.permute.xlu1 %v572_v17  ;;  %489 = vset.pattern.permute.xlu0 %v572_v17 }
  0x3c   :  { %346 = vperm.xlu1 %488, %v50_v8   ;;  %350 = vperm.xlu0 %489, %v51_v10  }
  0x40   :  { %354 = vperm.xlu1 %488, %v52_v9   ;;  %490 = vset.pattern.permute.xlu0 %v573_v18 }
  0x41   :  { %366 = vperm.xlu0 %490, %v50_v8  }
  0x44   :  { %358 = vperm.xlu1 %488, %v53_v11  }
  0x45   :  { %378 = vperm.xlu0 %490, %v53_v11  }
  0x48   :  { %491 = vset.pattern.permute.xlu1 %v573_v18 }
  0x49   :  { %370 = vperm.xlu1 %491, %v51_v10  }
  0x4d   :  { %374 = vperm.xlu1 %491, %v52_v9  }
  0xa8   :  { %v61_v19 = vpop.permute.xlu0 %60 }
  0xa9   :  { %v71_v20 = vpop.permute.xlu1 %70 }
  0xac   :  { %v66_v21 = vpop.permute.xlu0 %65 }
  0xad   :  { %v76_v27 = vpop.permute.xlu1 %75 }
  0xb2   :  { %v186_v40 = vpop.permute.xlu0 %185  ;;  %v190_v41 = vpop.permute.xlu1 %189 }
  0xb6   :  { %v198_v46 = vpop.permute.xlu0 %197  ;;  %v194_v51 = vpop.permute.xlu1 %193 }
 0x104   :  { %v441_v22 = vpop.f32.mrb[0].mxu0 }
 0x105   :  { %v163_v23 = vadd.f32 %v441_v22, %v66_v21  ;;  %v157_v24 = vpop.f32.mrb[1].mxu0 }
 0x106   :  { %v158_v25 = vadd.f32 %v157_v24, %v61_v19 }
 0x107   :  { %v177_v26 = vmax.f32 %v163_v23, 0.0 }
 0x108   :  { %v176_v28 = vmax.f32 %v158_v25, 0.0  ;;  %v444_v29 = vpop.f32.mrb[2].mxu0  ;;  %v347_v25 = vpop.permute.xlu1 %346 }
 0x109   :  { %v173_v30 = vadd.f32 %v444_v29, %v76_v27  ;;  %v167_v31 = vpop.f32.mrb[3].mxu0 }
 0x10a   :  { %v168_v32 = vadd.f32 %v167_v31, %v71_v20  ;;  %v467_v33 = vpack.c.bf16 %v177_v26, %v176_v28  ;;  %v351_v31 = vpop.permute.xlu0 %350 }
 0x10b   :  { %v179_v34 = vmax.f32 %v173_v30, 0.0 }
 0x10c   :  { %v178_v35 = vmax.f32 %v168_v32, 0.0  ;;  %468 = vmatprep.subr.bf16.mxu1 %v467_v33  ;;  %v355_v30 = vpop.permute.xlu1 %354 }
 0x10d   :  { %470 = vmatpush3.bf16.msra.mxu1 %v467_v33 }
 0x10e   :  { %v471_v36 = vpack.c.bf16 %v179_v34, %v178_v35  ;;  %v367_v34 = vpop.permute.xlu0 %366 }
 0x110   :  { %472 = vmatprep.subr.bf16.mxu1 %v471_v36  ;;  %v359_v32 = vpop.permute.xlu1 %358 }
 0x111   :  { %474 = vmatpush3.bf16.msra.mxu1 %v471_v36 }
 0x114   :  { %454 = vmatmul.mubr.msk.f32.vlgmr.msra.gmra.mrb[0].mxu1 %vm78_vm0, %v181_v37  ;;  %v371_v33 = vpop.permute.xlu1 %370 }
 0x115   :  { %456 = vmatprep.mubr.msk.f32.mxu1 %vm78_vm0, %v182_v38 }
 0x118   :  { %457 = vmatmul.mubr.msk.f32.gmra.mrb[2].mxu1 %vm78_vm0, %v183_v39 }
 0x1e7   :  { %v455_v42 = vpop.f32.mrb[0].mxu1 }
 0x1e8   :  { %v284_v43 = vadd.f32 %v455_v42, %v190_v41  ;;  %v278_v44 = vpop.f32.mrb[1].mxu1 }
 0x1e9   :  { %v279_v45 = vadd.f32 %v278_v44, %v186_v40  ;;  %v375_v44 = vpop.permute.xlu1 %374 }
 0x1ea   :  { %v298_v47 = vadd.f32 %v284_v43, %v638_v2 }
 0x1eb   :  { %v297_v48 = vadd.f32 %v279_v45, %v633_v1  ;;  %v458_v49 = vpop.f32.mrb[2].mxu1  ;;  %v379_v45 = vpop.permute.xlu0 %378 }
 0x1ec   :  { %v303_v50 = vsel %vm301_vm1, %v298_v47, 0.0  ;;  %v294_v52 = vadd.f32 %v458_v49, %v198_v46  ;;  %v288_v53 = vpop.f32.mrb[3].mxu1 }
 0x1ed   :  { %v302_v54 = vsel %vm301_vm1, %v297_v48, 0.0  ;;  %v289_v55 = vadd.f32 %v288_v53, %v194_v51 }
 0x1ee   :  { %v304_v56 = vadd.f32 %v303_v50, %v302_v54  ;;  %v300_v57 = vadd.f32 %v294_v52, %v650_v5 }
 0x1ef   :  { %v299_v58 = vadd.f32 %v289_v55, %v643_v3 }
 0x1f0   :  { %v307_v61 = vsel %vm301_vm1, %v300_v57, 0.0 }
 0x1f1   :  { %v305_v59 = vsel %vm301_vm1, %v299_v58, 0.0 }
 0x1f2   :  { %v306_v60 = vadd.f32 %v305_v59, %v304_v56 }
 0x1f4   :  { %v308_v62 = vadd.f32 %v307_v61, %v306_v60 }
 0x1f6   :  { %v309_v63 = vrot.slane %v308_v62, 4 }
 0x1f8   :  { %v310_v0 = vadd.f32 %v309_v63, %v308_v62 }
 0x1fa   :  { %v311_v1 = vrot.slane %v310_v0, 2 }
 0x1fc   :  { %v312_v2 = vadd.f32 %v311_v1, %v310_v0 }
 0x1fe   :  { %v313_v4 = vrot.slane %v312_v2, 1 }
 0x200   :  { %v314_v6 = vadd.f32 %v313_v4, %v312_v2 }
 0x202   :  { %v316_v7 = vmul.f32 0.03125, %v314_v6 }
 0x204   :  { %v318_v8 = vsub.f32 %v298_v47, %v316_v7  ;;  %v319_v9 = vsub.f32 %v299_v58, %v316_v7  ;;  %v320_v10 = vsub.f32 %v300_v57, %v316_v7  ;;  %v317_v11 = vsub.f32 %v297_v48, %v316_v7 }
 0x206   :  { %v323_v5 = vmul.f32 %v319_v9, %v319_v9  ;;  %v321_v12 = vmul.f32 %v317_v11, %v317_v11  ;;  %v322_v3 = vmul.f32 %v318_v8, %v318_v8  ;;  %v324_v13 = vmul.f32 %v320_v10, %v320_v10 }
 0x208   :  { %v325_v14 = vsel %vm301_vm1, %v321_v12, 0.0  ;;  %v326_v15 = vsel %vm301_vm1, %v322_v3, 0.0  ;;  %v328_v17 = vsel %vm301_vm1, %v323_v5, 0.0  ;;  %v330_v19 = vsel %vm301_vm1, %v324_v13, 0.0 }
 0x209   :  { %v327_v16 = vadd.f32 %v326_v15, %v325_v14 }
 0x20b   :  { %v329_v18 = vadd.f32 %v328_v17, %v327_v16 }
 0x20d   :  { %v331_v20 = vadd.f32 %v330_v19, %v329_v18 }
 0x20f   :  { %v332_v21 = vrot.slane %v331_v20, 4 }
 0x211   :  { %v333_v22 = vadd.f32 %v332_v21, %v331_v20 }
 0x213   :  { %v334_v23 = vrot.slane %v333_v22, 2 }
 0x215   :  { %v335_v24 = vadd.f32 %v334_v23, %v333_v22 }
 0x217   :  { %v336_v26 = vrot.slane %v335_v24, 1 }
 0x219   :  { %v337_v27 = vadd.f32 %v336_v26, %v335_v24 }
 0x21b   :  { %v338_v28 = vmul.f32 0.03125, %v337_v27 }
 0x21d   :  { %v339_v29 = vadd.f32 1e-05, %v338_v28 }
 0x21f   :  { %492 = vrsqrt.f32 %v339_v29 }
 0x229   :  { %v493_v35 = vpop.eup %492 }
 0x22a   :  { %v341_v36 = vmul.f32 %v493_v35, %v317_v11  ;;  %v343_v37 = vmul.f32 %v493_v35, %v319_v9  ;;  %v344_v38 = vmul.f32 %v493_v35, %v320_v10  ;;  %v342_v39 = vmul.f32 %v493_v35, %v318_v8 }
 0x22c   :  { %v361_v40 = vmul.f32 %v347_v25, %v341_v36  ;;  %v363_v41 = vmul.f32 %v355_v30, %v343_v37  ;;  %v364_v42 = vmul.f32 %v359_v32, %v344_v38  ;;  %v362_v43 = vmul.f32 %v351_v31, %v342_v39 }
 0x22e   :  { %v382_v46 = vadd.f32 %v371_v33, %v362_v43  ;;  %v381_v47 = vadd.f32 %v367_v34, %v361_v40  ;;  %v383_v48 = vadd.f32 %v375_v44, %v363_v41  ;;  %v384_v49 = vadd.f32 %v379_v45, %v364_v42 }
 0x230   :  { %386 = vst.msk [vmem:[#allocation7 + $0x8] sm:$0xff] %vm301_vm1, %v382_v46  ;;  %385 = vst.msk [vmem:[#allocation7] sm:$0xff] %vm301_vm1, %v381_v47 }
 0x231   :  { %387 = vst.msk [vmem:[#allocation7 + $0x10] sm:$0xff] %vm301_vm1, %v383_v48  ;;  %388 = vst.msk [vmem:[#allocation7 + $0x18] sm:$0xff] %vm301_vm1, %v384_v49 }
 0x232   :  { %549 = shalt.err (!%p546_p6)
}
 0x233   :  { %s550_s8 = scalar_lea.hbm %s709_s4, 512 }
 0x234   :  { %p551_p7 = scmp.ne.s32.totalorder %s709_s4, %s550_s8  ;;  %p554_p8 = scmp.lt.u32.totalorder %s550_s8, %s709_s4 }
 0x236   :  { %p556_p9 = pnand %p554_p8, %p551_p7 }
 0x238   :  { %559 = shalt.err (!%p556_p9)
}
 0x239   :  { %400 = dma.vmem_to_hbm [thread:$0]  %s395_s30, 512, %s709_s4, [#allocation4], %s567_s25, %s567_s25, %s568_s26  }
 0x23a   :  { %564 = dma.done.wait [#allocation4], 512  }
 0x23b   :  { %565 = vsyncadd [#allocation4], 4294966784 }
 0x23c   :  { %404 = vsyncpa [#allocation3], 1 }
 0x23d   :  { %405 = vsyncpa [#allocation6], 1 }
 0x23e   :  { %406 = vsyncpa [#allocation4], 1 }

</bundles_post_ra>
